<compile_context>
chip_gen: v5e
topology: v5e:2x2
jax: 0.10.0
libtpu: 0.0.40
codegen_flags: <defaults>
</compile_context>

<pallas_src>
import functools
import math

import jax
import jax.numpy as jnp
from jax.experimental import pallas as pl
from jax.experimental.pallas import tpu as pltpu

LN_EPS = 1e-5  # torch.nn.LayerNorm default
LANE = 128


def _mlp_kernel(x_ref, w0_ref, b0_ref, w1_ref, b1_ref, w2_ref, b2_ref,
                gamma_ref, beta_ref, o_ref, *, d_out_true):
    x = x_ref[...]

    # Layer 0: Linear + ReLU (padded cols of w0/b0 are zero -> padded h cols are 0).
    h = jnp.dot(x, w0_ref[...], preferred_element_type=jnp.float32) + b0_ref[...]
    h = jnp.maximum(h, 0.0)

    # Layer 1: Linear + ReLU
    h = jnp.dot(h, w1_ref[...], preferred_element_type=jnp.float32) + b1_ref[...]
    h = jnp.maximum(h, 0.0)

    # Layer 2: Linear (no activation). Padded output columns are exactly zero.
    y = jnp.dot(h, w2_ref[...], preferred_element_type=jnp.float32) + b2_ref[...]

    # LayerNorm over the TRUE feature width (padded lanes are exact zeros, so the
    # plain sum already equals the sum over the true features; use an explicit
    # divisor and mask the centered values so padding never leaks into variance).
    inv_d = 1.0 / float(d_out_true)
    mean = jnp.sum(y, axis=-1, keepdims=True) * inv_d
    if y.shape[-1] == d_out_true:
        centered = y - mean
    else:
        col = jax.lax.broadcasted_iota(jnp.int32, y.shape, dimension=1)
        centered = jnp.where(col < d_out_true, y - mean, 0.0)
    var = jnp.sum(centered * centered, axis=-1, keepdims=True) * inv_d
    inv = jax.lax.rsqrt(var + LN_EPS)

    # gamma/beta are zero in padded lanes -> padded output lanes are exactly 0.
    o_ref[...] = (centered * inv * gamma_ref[...] + beta_ref[...]).astype(o_ref.dtype)


def _round_up(n, m):
    return ((n + m - 1) // m) * m


def _pad_mat(a, rows, cols):
    r, c = a.shape
    return jnp.pad(a, ((0, rows - r), (0, cols - c)))


def _pad_row(a, cols):
    # 1-D (D,) -> 2-D (1, cols), zero-padded.
    return jnp.pad(a.reshape(1, -1), ((0, 0), (0, cols - a.shape[0])))


def _choose_tile_m(n, requested):
    if requested is not None:
        assert n % requested == 0, "batch must be divisible by tile_m"
        return requested
    # Prefer large row tiles (amortize ~0.35us/step); fully collapse for small N.
    for cand in (1024, 512, 256, 128, 64, 32, 16, 8):
        if n >= cand and n % cand == 0:
            return cand
    return n


def mlp_pallas(x, params, *, tile_m=None):
    """x: [N, D_in] float32. params: dict of weights/biases/gamma/beta."""
    N, D_in = x.shape
    H = params["w0"].shape[1]
    D_out = params["w2"].shape[1]

    d_in_p = _round_up(D_in, LANE)
    h_p = _round_up(H, LANE)
    d_out_p = _round_up(D_out, LANE)

    tm = _choose_tile_m(N, tile_m)

    # Zero-pad features to full 128-lane vregs; weights stored [in, out].
    x_p = _pad_mat(x, N, d_in_p)
    w0 = _pad_mat(params["w0"], d_in_p, h_p)
    b0 = _pad_row(params["b0"], h_p)
    w1 = _pad_mat(params["w1"], h_p, h_p)
    b1 = _pad_row(params["b1"], h_p)
    w2 = _pad_mat(params["w2"], h_p, d_out_p)
    b2 = _pad_row(params["b2"], d_out_p)
    gamma = _pad_row(params["gamma"], d_out_p)
    beta = _pad_row(params["beta"], d_out_p)

    # TODO(synk): if H ever grows past a few thousand, switch the full-resident
    # (H, H) weight spec to a K-tiled accumulator variant (v5e/v7x VMEM limits).

    kernel = functools.partial(_mlp_kernel, d_out_true=D_out)

    out_p = pl.pallas_call(
        kernel,
        out_shape=jax.ShapeDtypeStruct((N, d_out_p), jnp.float32),
        grid=(N // tm,),
        in_specs=[
            pl.BlockSpec((tm, d_in_p), lambda i: (i, 0)),     # x tile
            pl.BlockSpec((d_in_p, h_p), lambda i: (0, 0)),    # w0
            pl.BlockSpec((1, h_p), lambda i: (0, 0)),         # b0
            pl.BlockSpec((h_p, h_p), lambda i: (0, 0)),       # w1
            pl.BlockSpec((1, h_p), lambda i: (0, 0)),         # b1
            pl.BlockSpec((h_p, d_out_p), lambda i: (0, 0)),   # w2
            pl.BlockSpec((1, d_out_p), lambda i: (0, 0)),     # b2
            pl.BlockSpec((1, d_out_p), lambda i: (0, 0)),     # gamma
            pl.BlockSpec((1, d_out_p), lambda i: (0, 0)),     # beta
        ],
        out_specs=pl.BlockSpec((tm, d_out_p), lambda i: (i, 0)),
        compiler_params=pltpu.CompilerParams(
            dimension_semantics=("parallel",)),
    )(x_p, w0, b0, w1, b1, w2, b2, gamma, beta)

    return out_p[:, :D_out]


def init_params(key, input_size, hidden_size, output_size, layers=3):
    """Mirrors MLP.reset_parameters: W ~ N(0, 1/sqrt(in_features)), b = 0,
    LayerNorm gamma=1, beta=0. Weights stored as [in, out]."""
    assert layers == 3, "script instantiates the 3-layer configuration"
    k0, k1, k2 = jax.random.split(key, 3)
    return {
        "w0": jax.random.normal(k0, (input_size, hidden_size), jnp.float32)
              * (1.0 / math.sqrt(input_size)),
        "b0": jnp.zeros((hidden_size,), jnp.float32),
        "w1": jax.random.normal(k1, (hidden_size, hidden_size), jnp.float32)
              * (1.0 / math.sqrt(hidden_size)),
        "b1": jnp.zeros((hidden_size,), jnp.float32),
        "w2": jax.random.normal(k2, (hidden_size, output_size), jnp.float32)
              * (1.0 / math.sqrt(hidden_size)),
        "b2": jnp.zeros((output_size,), jnp.float32),
        "gamma": jnp.ones((output_size,), jnp.float32),
        "beta": jnp.zeros((output_size,), jnp.float32),
    }


def mlp_reference(x, p):
    h = jnp.maximum(x @ p["w0"] + p["b0"], 0.0)
    h = jnp.maximum(h @ p["w1"] + p["b1"], 0.0)
    y = h @ p["w2"] + p["b2"]
    mean = jnp.mean(y, axis=-1, keepdims=True)
    var = jnp.mean((y - mean) ** 2, axis=-1, keepdims=True)
    return (y - mean) / jnp.sqrt(var + LN_EPS) * p["gamma"] + p["beta"]


if __name__ == "__main__":
    key = jax.random.PRNGKey(0)
    kx, kp = jax.random.split(key)

    # MLP(input_size=16, hidden_size=32, output_size=16, layers=3, layernorm=True)
    N, D_in, H, D_out = 128, 16, 32, 16
    x = jax.random.normal(kx, (N, D_in), jnp.float32)
    params = init_params(kp, D_in, H, D_out, layers=3)

    out = mlp_pallas(x, params)          # tile_m auto -> 128 -> grid=(1,)
    jax.block_until_ready(out)

    ref = mlp_reference(x, params)
    assert out.shape == (N, D_out)
    assert jnp.allclose(out, ref, atol=1e-4, rtol=1e-4), "mismatch vs JAX reference"

    print("KERNEL_OK")
</pallas_src>

<mosaic_0001>
module attributes {stable_mosaic.version = 11 : i64} {
  func.func @_mlp_kernel(%arg0: i32, %arg1: memref<128x128xf32, #tpu.memory_space<vmem>>, %arg2: memref<128x128xf32, #tpu.memory_space<vmem>>, %arg3: memref<1x128xf32, #tpu.memory_space<vmem>>, %arg4: memref<128x128xf32, #tpu.memory_space<vmem>>, %arg5: memref<1x128xf32, #tpu.memory_space<vmem>>, %arg6: memref<128x128xf32, #tpu.memory_space<vmem>>, %arg7: memref<1x128xf32, #tpu.memory_space<vmem>>, %arg8: memref<1x128xf32, #tpu.memory_space<vmem>>, %arg9: memref<1x128xf32, #tpu.memory_space<vmem>>, %arg10: memref<128x128xf32, #tpu.memory_space<vmem>>) attributes {dimension_semantics = [#tpu.dimension_semantics<parallel>], iteration_bounds = array<i64: 1>, scalar_prefetch = 0 : i64, scratch_operands = 0 : i64, tpu.core_type = #tpu.core_type<tc>, window_params = [{transform_indices = @transform_0, window_bounds = array<i64: 128, 128>}, {pipeline_mode = #tpu.pipeline_mode<synchronous>, transform_indices = @transform_1, window_bounds = array<i64: 128, 128>}, {pipeline_mode = #tpu.pipeline_mode<synchronous>, transform_indices = @transform_2, window_bounds = array<i64: 1, 128>}, {pipeline_mode = #tpu.pipeline_mode<synchronous>, transform_indices = @transform_3, window_bounds = array<i64: 128, 128>}, {pipeline_mode = #tpu.pipeline_mode<synchronous>, transform_indices = @transform_4, window_bounds = array<i64: 1, 128>}, {pipeline_mode = #tpu.pipeline_mode<synchronous>, transform_indices = @transform_5, window_bounds = array<i64: 128, 128>}, {pipeline_mode = #tpu.pipeline_mode<synchronous>, transform_indices = @transform_6, window_bounds = array<i64: 1, 128>}, {pipeline_mode = #tpu.pipeline_mode<synchronous>, transform_indices = @transform_7, window_bounds = array<i64: 1, 128>}, {pipeline_mode = #tpu.pipeline_mode<synchronous>, transform_indices = @transform_8, window_bounds = array<i64: 1, 128>}, {transform_indices = @transform_9, window_bounds = array<i64: 128, 128>}]} {
    %c0 = arith.constant 0 : index
    %c0_0 = arith.constant 0 : index
    %0 = vector.load %arg1[%c0, %c0_0] : memref<128x128xf32, #tpu.memory_space<vmem>>, vector<128x128xf32>
    %c0_1 = arith.constant 0 : index
    %c0_2 = arith.constant 0 : index
    %1 = vector.load %arg2[%c0_1, %c0_2] : memref<128x128xf32, #tpu.memory_space<vmem>>, vector<128x128xf32>
    %cst = arith.constant dense<0.000000e+00> : vector<128x128xf32>
    %2 = tpu.matmul %0, %1, %cst {dimension_numbers = #tpu.dot_dimension_numbers<[1], [0], [0], [1], [0, 0, 1, 1], [], []>} : vector<128x128xf32>, vector<128x128xf32>, vector<128x128xf32> -> vector<128x128xf32>
    %c0_3 = arith.constant 0 : index
    %c0_4 = arith.constant 0 : index
    %3 = vector.load %arg3[%c0_3, %c0_4] : memref<1x128xf32, #tpu.memory_space<vmem>>, vector<1x128xf32>
    %4 = vector.broadcast %3 : vector<1x128xf32> to vector<128x128xf32>
    %5 = arith.addf %2, %4 : vector<128x128xf32>
    %cst_5 = arith.constant 0.000000e+00 : f32
    %6 = vector.broadcast %cst_5 : f32 to vector<128x128xf32>
    %7 = arith.maximumf %5, %6 : vector<128x128xf32>
    %c0_6 = arith.constant 0 : index
    %c0_7 = arith.constant 0 : index
    %8 = vector.load %arg4[%c0_6, %c0_7] : memref<128x128xf32, #tpu.memory_space<vmem>>, vector<128x128xf32>
    %cst_8 = arith.constant dense<0.000000e+00> : vector<128x128xf32>
    %9 = tpu.matmul %7, %8, %cst_8 {dimension_numbers = #tpu.dot_dimension_numbers<[1], [0], [0], [1], [0, 0, 1, 1], [], []>} : vector<128x128xf32>, vector<128x128xf32>, vector<128x128xf32> -> vector<128x128xf32>
    %c0_9 = arith.constant 0 : index
    %c0_10 = arith.constant 0 : index
    %10 = vector.load %arg5[%c0_9, %c0_10] : memref<1x128xf32, #tpu.memory_space<vmem>>, vector<1x128xf32>
    %11 = vector.broadcast %10 : vector<1x128xf32> to vector<128x128xf32>
    %12 = arith.addf %9, %11 : vector<128x128xf32>
    %cst_11 = arith.constant 0.000000e+00 : f32
    %13 = vector.broadcast %cst_11 : f32 to vector<128x128xf32>
    %14 = arith.maximumf %12, %13 : vector<128x128xf32>
    %c0_12 = arith.constant 0 : index
    %c0_13 = arith.constant 0 : index
    %15 = vector.load %arg6[%c0_12, %c0_13] : memref<128x128xf32, #tpu.memory_space<vmem>>, vector<128x128xf32>
    %cst_14 = arith.constant dense<0.000000e+00> : vector<128x128xf32>
    %16 = tpu.matmul %14, %15, %cst_14 {dimension_numbers = #tpu.dot_dimension_numbers<[1], [0], [0], [1], [0, 0, 1, 1], [], []>} : vector<128x128xf32>, vector<128x128xf32>, vector<128x128xf32> -> vector<128x128xf32>
    %c0_15 = arith.constant 0 : index
    %c0_16 = arith.constant 0 : index
    %17 = vector.load %arg7[%c0_15, %c0_16] : memref<1x128xf32, #tpu.memory_space<vmem>>, vector<1x128xf32>
    %18 = vector.broadcast %17 : vector<1x128xf32> to vector<128x128xf32>
    %19 = arith.addf %16, %18 : vector<128x128xf32>
    %cst_17 = arith.constant dense<0.000000e+00> : vector<128xf32>
    %20 = vector.multi_reduction <add>, %19, %cst_17 [1] : vector<128x128xf32> to vector<128xf32>
    %21 = vector.shape_cast %20 : vector<128xf32> to vector<128x1xf32>
    %cst_18 = arith.constant 6.250000e-02 : f32
    %22 = vector.broadcast %cst_18 : f32 to vector<128x1xf32>
    %23 = arith.mulf %21, %22 : vector<128x1xf32>
    %24 = tpu.iota {dimensions = array<i32: 1>} : vector<128x128xi32>
    %c16_i32 = arith.constant 16 : i32
    %25 = vector.broadcast %c16_i32 : i32 to vector<128x128xi32>
    %26 = arith.cmpi slt, %24, %25 : vector<128x128xi32>
    %27 = vector.broadcast %23 : vector<128x1xf32> to vector<128x128xf32>
    %28 = arith.subf %19, %27 : vector<128x128xf32>
    %cst_19 = arith.constant 0.000000e+00 : f32
    %29 = vector.broadcast %cst_19 : f32 to vector<128x128xf32>
    %30 = arith.select %26, %28, %29 : vector<128x128xi1>, vector<128x128xf32>
    %31 = arith.mulf %30, %30 : vector<128x128xf32>
    %cst_20 = arith.constant dense<0.000000e+00> : vector<128xf32>
    %32 = vector.multi_reduction <add>, %31, %cst_20 [1] : vector<128x128xf32> to vector<128xf32>
    %33 = vector.shape_cast %32 : vector<128xf32> to vector<128x1xf32>
    %cst_21 = arith.constant 6.250000e-02 : f32
    %34 = vector.broadcast %cst_21 : f32 to vector<128x1xf32>
    %35 = arith.mulf %33, %34 : vector<128x1xf32>
    %cst_22 = arith.constant 9.99999974E-6 : f32
    %36 = vector.broadcast %cst_22 : f32 to vector<128x1xf32>
    %37 = arith.addf %35, %36 : vector<128x1xf32>
    %38 = math.rsqrt %37 : vector<128x1xf32>
    %39 = vector.broadcast %38 : vector<128x1xf32> to vector<128x128xf32>
    %40 = arith.mulf %30, %39 : vector<128x128xf32>
    %c0_23 = arith.constant 0 : index
    %c0_24 = arith.constant 0 : index
    %41 = vector.load %arg8[%c0_23, %c0_24] : memref<1x128xf32, #tpu.memory_space<vmem>>, vector<1x128xf32>
    %42 = vector.broadcast %41 : vector<1x128xf32> to vector<128x128xf32>
    %43 = arith.mulf %40, %42 : vector<128x128xf32>
    %c0_25 = arith.constant 0 : index
    %c0_26 = arith.constant 0 : index
    %44 = vector.load %arg9[%c0_25, %c0_26] : memref<1x128xf32, #tpu.memory_space<vmem>>, vector<1x128xf32>
    %45 = vector.broadcast %44 : vector<1x128xf32> to vector<128x128xf32>
    %46 = arith.addf %43, %45 : vector<128x128xf32>
    %c0_27 = arith.constant 0 : index
    %c0_28 = arith.constant 0 : index
    %47 = vector.load %arg10[%c0_27, %c0_28] : memref<128x128xf32, #tpu.memory_space<vmem>>, vector<128x128xf32>
    tpu.vector_store %arg10[%c0_27, %c0_28], %46 {strides = array<i32>} : memref<128x128xf32, #tpu.memory_space<vmem>>, vector<128x128xf32>,
    return
  }
  func.func @transform_0(%arg0: i32) -> (i32, i32) {
    %c0_i32 = arith.constant 0 : i32
    %c0_i32_0 = arith.constant 0 : i32
    return %arg0, %c0_i32 : i32, i32
  }
  func.func @transform_1(%arg0: i32) -> (i32, i32) {
    %c0_i32 = arith.constant 0 : i32
    %c0_i32_0 = arith.constant 0 : i32
    %c0_i32_1 = arith.constant 0 : i32
    return %c0_i32, %c0_i32_0 : i32, i32
  }
  func.func @transform_2(%arg0: i32) -> (i32, i32) {
    %c0_i32 = arith.constant 0 : i32
    %c0_i32_0 = arith.constant 0 : i32
    %c0_i32_1 = arith.constant 0 : i32
    return %c0_i32, %c0_i32_0 : i32, i32
  }
  func.func @transform_3(%arg0: i32) -> (i32, i32) {
    %c0_i32 = arith.constant 0 : i32
    %c0_i32_0 = arith.constant 0 : i32
    %c0_i32_1 = arith.constant 0 : i32
    return %c0_i32, %c0_i32_0 : i32, i32
  }
  func.func @transform_4(%arg0: i32) -> (i32, i32) {
    %c0_i32 = arith.constant 0 : i32
    %c0_i32_0 = arith.constant 0 : i32
    %c0_i32_1 = arith.constant 0 : i32
    return %c0_i32, %c0_i32_0 : i32, i32
  }
  func.func @transform_5(%arg0: i32) -> (i32, i32) {
    %c0_i32 = arith.constant 0 : i32
    %c0_i32_0 = arith.constant 0 : i32
    %c0_i32_1 = arith.constant 0 : i32
    return %c0_i32, %c0_i32_0 : i32, i32
  }
  func.func @transform_6(%arg0: i32) -> (i32, i32) {
    %c0_i32 = arith.constant 0 : i32
    %c0_i32_0 = arith.constant 0 : i32
    %c0_i32_1 = arith.constant 0 : i32
    return %c0_i32, %c0_i32_0 : i32, i32
  }
  func.func @transform_7(%arg0: i32) -> (i32, i32) {
    %c0_i32 = arith.constant 0 : i32
    %c0_i32_0 = arith.constant 0 : i32
    %c0_i32_1 = arith.constant 0 : i32
    return %c0_i32, %c0_i32_0 : i32, i32
  }
  func.func @transform_8(%arg0: i32) -> (i32, i32) {
    %c0_i32 = arith.constant 0 : i32
    %c0_i32_0 = arith.constant 0 : i32
    %c0_i32_1 = arith.constant 0 : i32
    return %c0_i32, %c0_i32_0 : i32, i32
  }
  func.func @transform_9(%arg0: i32) -> (i32, i32) {
    %c0_i32 = arith.constant 0 : i32
    %c0_i32_0 = arith.constant 0 : i32
    return %arg0, %c0_i32 : i32, i32
  }
}

</mosaic_0001>

<bundles_post_ra>
// kernel: tpu_custom_call.1
= control target key start
LH: loop header
LB: loop body
LE: loop exit
PB: predicated region body
PF: predicated region fallthrough
CT: control target
= control target key end

     0   :  { %14 = vsyncpa [#allocation3], 0  ;;  %s1363_s0 = inlined_call_operand.hbm [shape: f32[128,128], index: 0, kind: input, shape index: {}]   ;;  %s1364_s1 = inlined_call_operand.hbm [shape: f32[128,128], index: 1, kind: input, shape index: {}]   ;;  %s1365_s2 = inlined_call_operand.vmem [shape: f32[1,128], index: 2, kind: input, shape index: {}]   ;;  %s1366_s3 = inlined_call_operand.hbm [shape: f32[128,128], index: 3, kind: input, shape index: {}]   ;;  %s1367_s4 = inlined_call_operand.vmem [shape: f32[1,128], index: 4, kind: input, shape index: {}]   ;;  %s1368_s5 = inlined_call_operand.hbm [shape: f32[128,128], index: 5, kind: input, shape index: {}]   ;;  %s1369_s6 = inlined_call_operand.vmem [shape: f32[1,128], index: 6, kind: input, shape index: {}]   ;;  %s1370_s7 = inlined_call_operand.vmem [shape: f32[1,128], index: 7, kind: input, shape index: {}]   ;;  %s1371_s8 = inlined_call_operand.vmem [shape: f32[1,128], index: 8, kind: input, shape index: {}]   ;;  %s1372_s9 = inlined_call_operand.hbm [shape: f32[128,128], index: 9, kind: output, shape index: {}]  }
   0x1   :  { %15 = vsyncpa [#allocation6], 0 }
   0x2   :  { %16 = vsyncpa [#allocation9], 0 }
   0x3   :  { %17 = vsyncpa [#allocation4], 0  ;;  %s35_s11 = sshll.u32 %s1364_s1, 4  ;;  %s1035_s12 = smov [#allocation5]   ;;  %s36_s11 = int_to_ptr.hbm [resolvable:$true] %s35_s11 }
   0x4   :  { %s37_s13 = sshll.u32 %s1035_s12, 4  ;;  %s22_s16 = sshll.u32 %s1363_s0, 4  ;;  %s38_s13 = int_to_ptr.vmem [resolvable:$true] %s37_s13  ;;  %s23_s16 = int_to_ptr.hbm [resolvable:$true] %s22_s16 }
   0x5   :  { %s1036_s17 = smov 128   ;;  %s1037_s18 = smov 8  }
   0x6   :  { %43 = dma.hbm_to_vmem [thread:$0]  %s36_s11, 2048, %s38_s13, [#allocation6], %s1036_s17, %s1036_s17, %s1037_s18  }
   0x7   :  { %s1038_s19 = smov [#allocation2]   ;;  %s50_s1 = sshll.u32 %s1366_s3, 4  ;;  %s51_s1 = int_to_ptr.hbm [resolvable:$true] %s50_s1 }
   0x8   :  { %s24_s20 = sshll.u32 %s1038_s19, 4  ;;  %s65_s24 = sshll.u32 %s1368_s5, 4  ;;  %s25_s20 = int_to_ptr.vmem [resolvable:$true] %s24_s20  ;;  %s66_s24 = int_to_ptr.hbm [resolvable:$true] %s65_s24 }
   0x9   :  { %30 = dma.hbm_to_vmem [thread:$0]  %s23_s16, 2048, %s25_s20, [#allocation3], %s1036_s17, %s1036_s17, %s1037_s18  }
   0xa   :  { %s1039_s25 = smov [#allocation7]   ;;  %s1040_s27 = smov [#allocation8]  }
   0xb   :  { %s52_s26 = sshll.u32 %s1039_s25, 4  ;;  %s67_s3 = sshll.u32 %s1040_s27, 4  ;;  %s53_s26 = int_to_ptr.vmem [resolvable:$true] %s52_s26  ;;  %s68_s3 = int_to_ptr.vmem [resolvable:$true] %s67_s3 }
   0xc   :  { %58 = dma.hbm_to_vmem [thread:$0]  %s51_s1, 2048, %s53_s26, [#allocation6], %s1036_s17, %s1036_s17, %s1037_s18  }
   0xd   :  { %73 = dma.hbm_to_vmem [thread:$0]  %s66_s24, 2048, %s68_s3, [#allocation9], %s1036_s17, %s1036_s17, %s1037_s18  }
   0xe   :  { %1027 = dma.done.wait [#allocation3], 2048  }
   0xf   :  { %1028 = vsyncadd [#allocation3], 4294965248 }
  0x10   :  { %1029 = dma.done.wait [#allocation6], 4096  }
  0x11   :  { %1030 = vsyncadd [#allocation6], 4294963200 }
  0x12   :  { %1031 = dma.done.wait [#allocation9], 2048  }
  0x13   :  { %1032 = vsyncadd [#allocation9], 4294965248  ;;  %v127_v0 = vld [vmem:[#allocation5 + $0x78] sm:$0xff]  ;;  %v126_v1 = vld [vmem:[#allocation5 + $0x70] sm:$0xff]  ;;  %s800_s15 = sshll.u32 %s1372_s9, 4  ;;  %s801_s15 = int_to_ptr.hbm [resolvable:$true] %s800_s15 }
  0x14   :  { %132 = vmatpush.msra.mxu0 %v127_v0  ;;  %815 = vmatpush.msra.mxu3 %v127_v0  ;;  %v125_v2 = vld [vmem:[#allocation5 + $0x68] sm:$0xff]  ;;  %v124_v3 = vld [vmem:[#allocation5 + $0x60] sm:$0xff]  ;;  %v123_v4 = vld [vmem:[#allocation5 + $0x58] sm:$0xff] }
  0x15   :  { %v122_v5 = vld [vmem:[#allocation5 + $0x50] sm:$0xff]  ;;  %v121_v6 = vld [vmem:[#allocation5 + $0x48] sm:$0xff]  ;;  %v120_v7 = vld [vmem:[#allocation5 + $0x40] sm:$0xff] }
  0x16   :  { %133 = vmatpush.msra.mxu0 %v126_v1  ;;  %816 = vmatpush.msra.mxu3 %v126_v1  ;;  %v119_v8 = vld [vmem:[#allocation5 + $0x38] sm:$0xff]  ;;  %v118_v9 = vld [vmem:[#allocation5 + $0x30] sm:$0xff]  ;;  %v117_v10 = vld [vmem:[#allocation5 + $0x28] sm:$0xff] }
  0x17   :  { %v116_v11 = vld [vmem:[#allocation5 + $0x20] sm:$0xff]  ;;  %v115_v12 = vld [vmem:[#allocation5 + $0x18] sm:$0xff]  ;;  %v114_v13 = vld [vmem:[#allocation5 + $0x10] sm:$0xff] }
  0x18   :  { %134 = vmatpush.msra.mxu0 %v125_v2  ;;  %817 = vmatpush.msra.mxu3 %v125_v2  ;;  %v113_v14 = vld [vmem:[#allocation5 + $0x8] sm:$0xff]  ;;  %v112_v15 = vld [vmem:[#allocation5] sm:$0xff]  ;;  %v98_v20 = vld [vmem:[#allocation2 + $0x10] sm:$0xff] }
  0x19   :  { %v96_v16 = vld [vmem:[#allocation2] sm:$0xff]  ;;  %v97_v18 = vld [vmem:[#allocation2 + $0x8] sm:$0xff]  ;;  %v99_v21 = vld [vmem:[#allocation2 + $0x18] sm:$0xff] }
  0x1a   :  { %135 = vmatpush.msra.mxu0 %v124_v3  ;;  %818 = vmatpush.msra.mxu3 %v124_v3  ;;  %v108_v17 = vld [vmem:[#allocation2 + $0x60] sm:$0xff]  ;;  %v109_v19 = vld [vmem:[#allocation2 + $0x68] sm:$0xff]  ;;  %v110_v22 = vld [vmem:[#allocation2 + $0x70] sm:$0xff] }
  0x1b   :  { %v100_v23 = vld [vmem:[#allocation2 + $0x20] sm:$0xff]  ;;  %v111_v24 = vld [vmem:[#allocation2 + $0x78] sm:$0xff]  ;;  %v101_v25 = vld [vmem:[#allocation2 + $0x28] sm:$0xff] }
  0x1c   :  { %136 = vmatpush.msra.mxu0 %v123_v4  ;;  %819 = vmatpush.msra.mxu3 %v123_v4  ;;  %v102_v26 = vld [vmem:[#allocation2 + $0x30] sm:$0xff]  ;;  %v103_v27 = vld [vmem:[#allocation2 + $0x38] sm:$0xff]  ;;  %v226_v30 = vld [vmem:[#allocation7 + $0x68] sm:$0xff] }
  0x1d   :  { %v228_v28 = vld [vmem:[#allocation7 + $0x78] sm:$0xff]  ;;  %v227_v29 = vld [vmem:[#allocation7 + $0x70] sm:$0xff]  ;;  %v225_v31 = vld [vmem:[#allocation7 + $0x60] sm:$0xff] }
  0x1e   :  { %137 = vmatpush.msra.mxu0 %v122_v5  ;;  %820 = vmatpush.msra.mxu3 %v122_v5  ;;  %v104_v32 = vld [vmem:[#allocation2 + $0x40] sm:$0xff]  ;;  %v224_v33 = vld [vmem:[#allocation7 + $0x58] sm:$0xff]  ;;  %v223_v34 = vld [vmem:[#allocation7 + $0x50] sm:$0xff] }
  0x1f   :  { %233 = vmatpush.msra.mxu1 %v228_v28  ;;  %v222_v35 = vld [vmem:[#allocation7 + $0x48] sm:$0xff]  ;;  %v221_v36 = vld [vmem:[#allocation7 + $0x40] sm:$0xff]  ;;  %v220_v38 = vld [vmem:[#allocation7 + $0x38] sm:$0xff] }
  0x20   :  { %138 = vmatpush.msra.mxu0 %v121_v6  ;;  %821 = vmatpush.msra.mxu3 %v121_v6  ;;  %v105_v37 = vld [vmem:[#allocation2 + $0x48] sm:$0xff]  ;;  %v219_v39 = vld [vmem:[#allocation7 + $0x30] sm:$0xff]  ;;  %v217_v41 = vld [vmem:[#allocation7 + $0x20] sm:$0xff] }
  0x21   :  { %234 = vmatpush.msra.mxu1 %v227_v29  ;;  %v218_v40 = vld [vmem:[#allocation7 + $0x28] sm:$0xff]  ;;  %v106_v42 = vld [vmem:[#allocation2 + $0x50] sm:$0xff]  ;;  %v216_v43 = vld [vmem:[#allocation7 + $0x18] sm:$0xff] }
  0x22   :  { %139 = vmatpush.msra.mxu0 %v120_v7  ;;  %822 = vmatpush.msra.mxu3 %v120_v7  ;;  %v107_v44 = vld [vmem:[#allocation2 + $0x58] sm:$0xff]  ;;  %v215_v45 = vld [vmem:[#allocation7 + $0x10] sm:$0xff]  ;;  %v214_v46 = vld [vmem:[#allocation7 + $0x8] sm:$0xff] }
  0x23   :  { %235 = vmatpush.msra.mxu1 %v226_v30  ;;  %v213_v47 = vld [vmem:[#allocation7] sm:$0xff] }
  0x24   :  { %140 = vmatpush.msra.mxu0 %v119_v8  ;;  %823 = vmatpush.msra.mxu3 %v119_v8  ;;  %v1119_v48 = vld [vmem:[%s1365_s2] ss:$0 sm:$0xff] }
  0x25   :  { %236 = vmatpush.msra.mxu1 %v225_v31 }
  0x26   :  { %141 = vmatpush.msra.mxu0 %v118_v9  ;;  %824 = vmatpush.msra.mxu3 %v118_v9 }
  0x27   :  { %237 = vmatpush.msra.mxu1 %v224_v33 }
  0x28   :  { %142 = vmatpush.msra.mxu0 %v117_v10  ;;  %825 = vmatpush.msra.mxu3 %v117_v10 }
  0x29   :  { %238 = vmatpush.msra.mxu1 %v223_v34 }
  0x2a   :  { %143 = vmatpush.msra.mxu0 %v116_v11  ;;  %826 = vmatpush.msra.mxu3 %v116_v11 }
  0x2b   :  { %239 = vmatpush.msra.mxu1 %v222_v35 }
  0x2c   :  { %144 = vmatpush.msra.mxu0 %v115_v12  ;;  %827 = vmatpush.msra.mxu3 %v115_v12 }
  0x2d   :  { %240 = vmatpush.msra.mxu1 %v221_v36 }
  0x2e   :  { %145 = vmatpush.msra.mxu0 %v114_v13  ;;  %828 = vmatpush.msra.mxu3 %v114_v13 }
  0x2f   :  { %241 = vmatpush.msra.mxu1 %v220_v38 }
  0x30   :  { %146 = vmatpush.msra.mxu0 %v113_v14  ;;  %829 = vmatpush.msra.mxu3 %v113_v14 }
  0x31   :  { %242 = vmatpush.msra.mxu1 %v219_v39 }
  0x32   :  { %147 = vmatpush.msra.mxu0 %v112_v15  ;;  %830 = vmatpush.msra.mxu3 %v112_v15 }
  0x33   :  { %148 = vmatmul.f32.vlgmr.msra.gmra.mxu0 %v96_v16  ;;  %184 = vmatmul.f32.vlgmr.msra.gmra.mxu3 %v108_v17 }
  0x34   :  { %831 = vmatpush.msrb.mxu3 %v228_v28  ;;  %243 = vmatpush.msra.mxu1 %v218_v40  ;;  %v325_v28 = vld [vmem:[#allocation8 + $0x58] sm:$0xff] }
  0x36   :  { %832 = vmatpush.msrb.mxu3 %v227_v29  ;;  %244 = vmatpush.msra.mxu1 %v217_v41  ;;  %v324_v29 = vld [vmem:[#allocation8 + $0x50] sm:$0xff] }
  0x38   :  { %833 = vmatpush.msrb.mxu3 %v226_v30  ;;  %245 = vmatpush.msra.mxu1 %v216_v43  ;;  %v323_v30 = vld [vmem:[#allocation8 + $0x48] sm:$0xff] }
  0x3a   :  { %834 = vmatpush.msrb.mxu3 %v225_v31  ;;  %246 = vmatpush.msra.mxu1 %v215_v45 }
  0x3b   :  { %151 = vmatmul.f32.gmra.mxu0 %v97_v18  ;;  %187 = vmatmul.f32.gmra.mxu3 %v109_v19 }
  0x3c   :  { %835 = vmatpush.msrb.mxu3 %v224_v33  ;;  %247 = vmatpush.msra.mxu1 %v214_v46  ;;  %v322_v33 = vld [vmem:[#allocation8 + $0x40] sm:$0xff] }
  0x3e   :  { %836 = vmatpush.msrb.mxu3 %v223_v34  ;;  %248 = vmatpush.msra.mxu1 %v213_v47 }
  0x40   :  { %837 = vmatpush.msrb.mxu3 %v222_v35  ;;  %v321_v35 = vld [vmem:[#allocation8 + $0x38] sm:$0xff] }
  0x42   :  { %838 = vmatpush.msrb.mxu3 %v221_v36  ;;  %v320_v36 = vld [vmem:[#allocation8 + $0x30] sm:$0xff] }
  0x43   :  { %154 = vmatmul.f32.gmra.mxu0 %v98_v20  ;;  %190 = vmatmul.f32.gmra.mxu3 %v110_v22  ;;  %v328_v22 = vld [vmem:[#allocation8 + $0x70] sm:$0xff] }
  0x44   :  { %839 = vmatpush.msrb.mxu3 %v220_v38 }
  0x46   :  { %840 = vmatpush.msrb.mxu3 %v219_v39 }
  0x48   :  { %841 = vmatpush.msrb.mxu3 %v218_v40  ;;  %v318_v40 = vld [vmem:[#allocation8 + $0x20] sm:$0xff] }
  0x4a   :  { %842 = vmatpush.msrb.mxu3 %v217_v41 }
  0x4b   :  { %157 = vmatmul.f32.gmra.mxu0 %v99_v21  ;;  %193 = vmatmul.f32.gmra.mxu3 %v111_v24  ;;  %v329_v21 = vld [vmem:[#allocation8 + $0x78] sm:$0xff] }
  0x4c   :  { %843 = vmatpush.msrb.mxu3 %v216_v43  ;;  %334 = vmatpush.msra.mxu2 %v329_v21 }
  0x4e   :  { %844 = vmatpush.msrb.mxu3 %v215_v45  ;;  %335 = vmatpush.msra.mxu2 %v328_v22 }
  0x50   :  { %845 = vmatpush.msrb.mxu3 %v214_v46  ;;  %v316_v46 = vld [vmem:[#allocation8 + $0x10] sm:$0xff] }
  0x52   :  { %846 = vmatpush.msrb.mxu3 %v213_v47  ;;  %v315_v47 = vld [vmem:[#allocation8 + $0x8] sm:$0xff] }
  0x53   :  { %160 = vmatmul.f32.gmra.mxu0 %v100_v23  ;;  %v327_v23 = vld [vmem:[#allocation8 + $0x68] sm:$0xff] }
  0x54   :  { %847 = vmatpush.msra.mxu3 %v329_v21  ;;  %336 = vmatpush.msra.mxu2 %v327_v23 }
  0x56   :  { %848 = vmatpush.msra.mxu3 %v328_v22 }
  0x58   :  { %849 = vmatpush.msra.mxu3 %v327_v23 }
  0x5b   :  { %163 = vmatmul.f32.gmra.mxu0 %v101_v25 }
  0x63   :  { %166 = vmatmul.f32.gmra.mxu0 %v102_v26  ;;  %v326_v26 = vld [vmem:[#allocation8 + $0x60] sm:$0xff] }
  0x64   :  { %337 = vmatpush.msra.mxu2 %v326_v26  ;;  %850 = vmatpush.msra.mxu3 %v326_v26 }
  0x66   :  { %338 = vmatpush.msra.mxu2 %v325_v28  ;;  %851 = vmatpush.msra.mxu3 %v325_v28 }
  0x68   :  { %339 = vmatpush.msra.mxu2 %v324_v29  ;;  %852 = vmatpush.msra.mxu3 %v324_v29 }
  0x6a   :  { %340 = vmatpush.msra.mxu2 %v323_v30  ;;  %853 = vmatpush.msra.mxu3 %v323_v30 }
  0x6b   :  { %169 = vmatmul.f32.gmra.mxu0 %v103_v27 }
  0x6c   :  { %341 = vmatpush.msra.mxu2 %v322_v33  ;;  %854 = vmatpush.msra.mxu3 %v322_v33 }
  0x6e   :  { %342 = vmatpush.msra.mxu2 %v321_v35  ;;  %855 = vmatpush.msra.mxu3 %v321_v35 }
  0x70   :  { %343 = vmatpush.msra.mxu2 %v320_v36  ;;  %856 = vmatpush.msra.mxu3 %v320_v36 }
  0x73   :  { %172 = vmatmul.f32.gmra.mxu0 %v104_v32 }
  0x7b   :  { %175 = vmatmul.f32.gmra.mxu0 %v105_v37  ;;  %v319_v37 = vld [vmem:[#allocation8 + $0x28] sm:$0xff] }
  0x7c   :  { %344 = vmatpush.msra.mxu2 %v319_v37  ;;  %857 = vmatpush.msra.mxu3 %v319_v37 }
  0x7e   :  { %345 = vmatpush.msra.mxu2 %v318_v40  ;;  %858 = vmatpush.msra.mxu3 %v318_v40 }
  0x83   :  { %178 = vmatmul.f32.gmra.mxu0 %v106_v42  ;;  %v317_v42 = vld [vmem:[#allocation8 + $0x18] sm:$0xff] }
  0x84   :  { %346 = vmatpush.msra.mxu2 %v317_v42  ;;  %859 = vmatpush.msra.mxu3 %v317_v42 }
  0x86   :  { %347 = vmatpush.msra.mxu2 %v316_v46  ;;  %860 = vmatpush.msra.mxu3 %v316_v46 }
  0x88   :  { %348 = vmatpush.msra.mxu2 %v315_v47  ;;  %861 = vmatpush.msra.mxu3 %v315_v47 }
  0x8b   :  { %181 = vmatmul.f32.gmra.mxu0 %v107_v44 }
  0xb0   :  { %v149_v49 = vpop.f32.mrf.mxu0 }
  0xb1   :  { %v150_v50 = vadd.f32 %v1119_v48, %v149_v49  ;;  %v314_v49 = vld [vmem:[#allocation8] sm:$0xff] }
  0xb2   :  { %349 = vmatpush.msra.mxu2 %v314_v49  ;;  %862 = vmatpush.msra.mxu3 %v314_v49 }
  0xb3   :  { %v197_v51 = vmax.f32 %v150_v50, 0.0  ;;  %v871_v50 = vld [vmem:[%s1367_s4] ss:$0 sm:$0xff] }
  0xb5   :  { %249 = vmatmul.f32.vlgmr.msra.gmra.mxu1 %v197_v51 }
  0xb6   :  { %v185_v52 = vpop.f32.mrf.mxu3 }
  0xb7   :  { %v186_v53 = vadd.f32 %v1119_v48, %v185_v52 }
  0xb8   :  { %v152_v54 = vpop.f32.mrf.mxu0 }
  0xb9   :  { %v153_v55 = vadd.f32 %v1119_v48, %v152_v54  ;;  %v209_v56 = vmax.f32 %v186_v53, 0.0 }
  0xbb   :  { %v198_v57 = vmax.f32 %v153_v55, 0.0  ;;  %285 = vmatmul.f32.vlgmr.msrb.gmra.mxu3 %v209_v56 }
  0xbd   :  { %252 = vmatmul.f32.gmra.mxu1 %v198_v57 }
  0xbe   :  { %v188_v58 = vpop.f32.mrf.mxu3 }
  0xbf   :  { %v189_v59 = vadd.f32 %v1119_v48, %v188_v58 }
  0xc0   :  { %v155_v60 = vpop.f32.mrf.mxu0 }
  0xc1   :  { %v156_v61 = vadd.f32 %v1119_v48, %v155_v60  ;;  %v210_v62 = vmax.f32 %v189_v59, 0.0 }
  0xc3   :  { %v199_v63 = vmax.f32 %v156_v61, 0.0  ;;  %288 = vmatmul.f32.gmra.mxu3 %v210_v62 }
  0xc5   :  { %255 = vmatmul.f32.gmra.mxu1 %v199_v63 }
  0xc6   :  { %v191_v5 = vpop.f32.mrf.mxu3 }
  0xc7   :  { %v192_v7 = vadd.f32 %v1119_v48, %v191_v5 }
  0xc8   :  { %v158_v0 = vpop.f32.mrf.mxu0 }
  0xc9   :  { %v159_v1 = vadd.f32 %v1119_v48, %v158_v0  ;;  %v211_v8 = vmax.f32 %v192_v7, 0.0 }
  0xcb   :  { %v200_v2 = vmax.f32 %v159_v1, 0.0  ;;  %291 = vmatmul.f32.gmra.mxu3 %v211_v8 }
  0xcd   :  { %258 = vmatmul.f32.gmra.mxu1 %v200_v2 }
  0xce   :  { %v194_v11 = vpop.f32.mrf.mxu3 }
  0xcf   :  { %v195_v13 = vadd.f32 %v1119_v48, %v194_v11 }
  0xd0   :  { %v161_v3 = vpop.f32.mrf.mxu0 }
  0xd1   :  { %v162_v4 = vadd.f32 %v1119_v48, %v161_v3  ;;  %v212_v14 = vmax.f32 %v195_v13, 0.0 }
  0xd3   :  { %v201_v6 = vmax.f32 %v162_v4, 0.0  ;;  %294 = vmatmul.f32.gmra.mxu3 %v212_v14 }
  0xd5   :  { %261 = vmatmul.f32.gmra.mxu1 %v201_v6 }
  0xd8   :  { %v164_v9 = vpop.f32.mrf.mxu0 }
  0xd9   :  { %v165_v10 = vadd.f32 %v1119_v48, %v164_v9 }
  0xdb   :  { %v202_v12 = vmax.f32 %v165_v10, 0.0 }
  0xdd   :  { %264 = vmatmul.f32.gmra.mxu1 %v202_v12 }
  0xe0   :  { %v167_v15 = vpop.f32.mrf.mxu0 }
  0xe1   :  { %v168_v16 = vadd.f32 %v1119_v48, %v167_v15 }
  0xe3   :  { %v203_v17 = vmax.f32 %v168_v16, 0.0 }
  0xe5   :  { %267 = vmatmul.f32.gmra.mxu1 %v203_v17 }
  0xe8   :  { %v170_v18 = vpop.f32.mrf.mxu0 }
  0xe9   :  { %v171_v19 = vadd.f32 %v1119_v48, %v170_v18 }
  0xeb   :  { %v204_v20 = vmax.f32 %v171_v19, 0.0 }
  0xed   :  { %270 = vmatmul.f32.gmra.mxu1 %v204_v20 }
  0xf0   :  { %v173_v24 = vpop.f32.mrf.mxu0 }
  0xf1   :  { %v174_v25 = vadd.f32 %v1119_v48, %v173_v24 }
  0xf3   :  { %v205_v27 = vmax.f32 %v174_v25, 0.0 }
  0xf5   :  { %273 = vmatmul.f32.gmra.mxu1 %v205_v27 }
  0xf8   :  { %v176_v31 = vpop.f32.mrf.mxu0 }
  0xf9   :  { %v177_v32 = vadd.f32 %v1119_v48, %v176_v31 }
  0xfb   :  { %v206_v34 = vmax.f32 %v177_v32, 0.0 }
  0xfd   :  { %276 = vmatmul.f32.gmra.mxu1 %v206_v34  ;;  %v872_v34 = vld [vmem:[%s1369_s6] ss:$0 sm:$0xff] }
 0x100   :  { %v179_v38 = vpop.f32.mrf.mxu0 }
 0x101   :  { %v180_v39 = vadd.f32 %v1119_v48, %v179_v38 }
 0x103   :  { %v207_v41 = vmax.f32 %v180_v39, 0.0 }
 0x105   :  { %279 = vmatmul.f32.gmra.mxu1 %v207_v41 }
 0x108   :  { %v182_v43 = vpop.f32.mrf.mxu0 }
 0x109   :  { %v183_v44 = vadd.f32 %v1119_v48, %v182_v43 }
 0x10b   :  { %v208_v45 = vmax.f32 %v183_v44, 0.0 }
 0x10d   :  { %282 = vmatmul.f32.gmra.mxu1 %v208_v45 }
 0x132   :  { %v250_v51 = vpop.f32.mrf.mxu1 }
 0x133   :  { %v251_v52 = vadd.f32 %v871_v50, %v250_v51 }
 0x135   :  { %v298_v53 = vmax.f32 %v251_v52, 0.0 }
 0x137   :  { %350 = vmatmul.f32.vlgmr.msra.gmra.mxu2 %v298_v53 }
 0x13a   :  { %v253_v48 = vpop.f32.mrf.mxu1 }
 0x13b   :  { %v254_v54 = vadd.f32 %v871_v50, %v253_v48 }
 0x13d   :  { %v299_v55 = vmax.f32 %v254_v54, 0.0 }
 0x13e   :  { %v286_v56 = vpop.f32.mrf.mxu3 }
 0x13f   :  { %353 = vmatmul.f32.gmra.mxu2 %v299_v55  ;;  %v287_v57 = vadd.f32 %v871_v50, %v286_v56 }
 0x141   :  { %v310_v58 = vmax.f32 %v287_v57, 0.0 }
 0x142   :  { %v256_v59 = vpop.f32.mrf.mxu1 }
 0x143   :  { %v257_v60 = vadd.f32 %v871_v50, %v256_v59  ;;  %386 = vmatmul.f32.vlgmr.msra.gmra.mxu3 %v310_v58 }
 0x145   :  { %v300_v61 = vmax.f32 %v257_v60, 0.0 }
 0x146   :  { %v289_v62 = vpop.f32.mrf.mxu3 }
 0x147   :  { %356 = vmatmul.f32.gmra.mxu2 %v300_v61  ;;  %v290_v63 = vadd.f32 %v871_v50, %v289_v62 }
 0x149   :  { %v311_v0 = vmax.f32 %v290_v63, 0.0 }
 0x14a   :  { %v259_v1 = vpop.f32.mrf.mxu1 }
 0x14b   :  { %v260_v2 = vadd.f32 %v871_v50, %v259_v1  ;;  %389 = vmatmul.f32.gmra.mxu3 %v311_v0 }
 0x14d   :  { %v301_v3 = vmax.f32 %v260_v2, 0.0 }
 0x14e   :  { %v292_v8 = vpop.f32.mrf.mxu3 }
 0x14f   :  { %359 = vmatmul.f32.gmra.mxu2 %v301_v3  ;;  %v293_v10 = vadd.f32 %v871_v50, %v292_v8  ;;  %v447_v3 = vlaneseq }
 0x151   :  { %v312_v12 = vmax.f32 %v293_v10, 0.0 }
 0x152   :  { %v262_v4 = vpop.f32.mrf.mxu1 }
 0x153   :  { %v263_v5 = vadd.f32 %v871_v50, %v262_v4  ;;  %392 = vmatmul.f32.gmra.mxu3 %v312_v12  ;;  %v1182_v4 = vand.u32 127, %v447_v3 }
 0x155   :  { %v302_v6 = vmax.f32 %v263_v5, 0.0  ;;  %vm449_vm0 = vcmp.lt.s32.totalorder %v1182_v4, 16 }
 0x156   :  { %v295_v14 = vpop.f32.mrf.mxu3 }
 0x157   :  { %362 = vmatmul.f32.gmra.mxu2 %v302_v6  ;;  %v296_v16 = vadd.f32 %v871_v50, %v295_v14 }
 0x159   :  { %v313_v18 = vmax.f32 %v296_v16, 0.0 }
 0x15a   :  { %v265_v7 = vpop.f32.mrf.mxu1 }
 0x15b   :  { %v266_v9 = vadd.f32 %v871_v50, %v265_v7  ;;  %395 = vmatmul.f32.gmra.mxu3 %v313_v18 }
 0x15d   :  { %v303_v11 = vmax.f32 %v266_v9, 0.0 }
 0x15f   :  { %365 = vmatmul.f32.gmra.mxu2 %v303_v11 }
 0x162   :  { %v268_v13 = vpop.f32.mrf.mxu1 }
 0x163   :  { %v269_v15 = vadd.f32 %v871_v50, %v268_v13 }
 0x165   :  { %v304_v17 = vmax.f32 %v269_v15, 0.0 }
 0x167   :  { %368 = vmatmul.f32.gmra.mxu2 %v304_v17 }
 0x16a   :  { %v271_v19 = vpop.f32.mrf.mxu1 }
 0x16b   :  { %v272_v20 = vadd.f32 %v871_v50, %v271_v19 }
 0x16d   :  { %v305_v21 = vmax.f32 %v272_v20, 0.0 }
 0x16f   :  { %371 = vmatmul.f32.gmra.mxu2 %v305_v21 }
 0x172   :  { %v274_v22 = vpop.f32.mrf.mxu1 }
 0x173   :  { %v275_v23 = vadd.f32 %v871_v50, %v274_v22 }
 0x175   :  { %v306_v24 = vmax.f32 %v275_v23, 0.0 }
 0x177   :  { %374 = vmatmul.f32.gmra.mxu2 %v306_v24 }
 0x17a   :  { %v277_v25 = vpop.f32.mrf.mxu1 }
 0x17b   :  { %v278_v26 = vadd.f32 %v871_v50, %v277_v25 }
 0x17d   :  { %v307_v27 = vmax.f32 %v278_v26, 0.0 }
 0x17f   :  { %377 = vmatmul.f32.gmra.mxu2 %v307_v27 }
 0x182   :  { %v280_v28 = vpop.f32.mrf.mxu1 }
 0x183   :  { %v281_v29 = vadd.f32 %v871_v50, %v280_v28 }
 0x185   :  { %v308_v30 = vmax.f32 %v281_v29, 0.0 }
 0x187   :  { %380 = vmatmul.f32.gmra.mxu2 %v308_v30 }
 0x18a   :  { %v283_v31 = vpop.f32.mrf.mxu1 }
 0x18b   :  { %v284_v32 = vadd.f32 %v871_v50, %v283_v31 }
 0x18d   :  { %v309_v33 = vmax.f32 %v284_v32, 0.0 }
 0x18f   :  { %383 = vmatmul.f32.gmra.mxu2 %v309_v33 }
 0x1ba   :  { %v351_v35 = vpop.f32.mrf.mxu2 }
 0x1bb   :  { %v352_v36 = vadd.f32 %v872_v34, %v351_v35 }
 0x1bd   :  { %399 = vadd.xlane.f32.xlu0 %v352_v36 }
 0x1c2   :  { %v354_v37 = vpop.f32.mrf.mxu2 }
 0x1c3   :  { %v355_v38 = vadd.f32 %v872_v34, %v354_v37 }
 0x1c5   :  { %401 = vadd.xlane.f32.xlu0 %v355_v38 }
 0x1c6   :  { %v387_v39 = vpop.f32.mrf.mxu3 }
 0x1c7   :  { %v1143_v40 = vadd.f32 %v872_v34, %v387_v39 }
 0x1ca   :  { %v357_v41 = vpop.f32.mrf.mxu2 }
 0x1cb   :  { %v358_v42 = vadd.f32 %v872_v34, %v357_v41 }
 0x1cd   :  { %403 = vadd.xlane.f32.xlu1 %v358_v42  ;;  %423 = vadd.xlane.f32.xlu0 %v1143_v40 }
 0x1ce   :  { %v390_v43 = vpop.f32.mrf.mxu3 }
 0x1cf   :  { %v1146_v44 = vadd.f32 %v872_v34, %v390_v43 }
 0x1d2   :  { %v360_v45 = vpop.f32.mrf.mxu2 }
 0x1d3   :  { %v1149_v47 = vadd.f32 %v872_v34, %v360_v45 }
 0x1d5   :  { %425 = vadd.xlane.f32.xlu1 %v1146_v44 }
 0x1d6   :  { %v393_v57 = vpop.f32.mrf.mxu3 }
 0x1d7   :  { %v1179_v2 = vadd.f32 %v872_v34, %v393_v57 }
 0x1da   :  { %v363_v46 = vpop.f32.mrf.mxu2 }
 0x1db   :  { %v1151_v49 = vadd.f32 %v872_v34, %v363_v46 }
 0x1dd   :  { %407 = vadd.xlane.f32.xlu2 %v1151_v49  ;;  %405 = vadd.xlane.f32.xlu1 %v1149_v47 }
 0x1de   :  { %v396_v60 = vpop.f32.mrf.mxu3 }
 0x1df   :  { %v1170_v61 = vadd.f32 %v872_v34, %v396_v60 }
 0x1e2   :  { %v366_v50 = vpop.f32.mrf.mxu2 }
 0x1e3   :  { %v1155_v51 = vadd.f32 %v872_v34, %v366_v50 }
 0x1e5   :  { %409 = vadd.xlane.f32.xlu2 %v1155_v51 }
 0x1ea   :  { %v369_v52 = vpop.f32.mrf.mxu2 }
 0x1eb   :  { %v1158_v53 = vadd.f32 %v872_v34, %v369_v52 }
 0x1ed   :  { %411 = vadd.xlane.f32.xlu0 %v1158_v53 }
 0x1f2   :  { %v372_v48 = vpop.f32.mrf.mxu2 }
 0x1f3   :  { %v1161_v54 = vadd.f32 %v872_v34, %v372_v48 }
 0x1f5   :  { %413 = vadd.xlane.f32.xlu1 %v1161_v54 }
 0x1fa   :  { %v375_v55 = vpop.f32.mrf.mxu2 }
 0x1fb   :  { %v1164_v56 = vadd.f32 %v872_v34, %v375_v55 }
 0x1fd   :  { %415 = vadd.xlane.f32.xlu2 %v1164_v56 }
 0x202   :  { %v378_v58 = vpop.f32.mrf.mxu2 }
 0x203   :  { %v1167_v59 = vadd.f32 %v872_v34, %v378_v58 }
 0x205   :  { %417 = vadd.xlane.f32.xlu0 %v1167_v59 }
 0x20a   :  { %v381_v62 = vpop.f32.mrf.mxu2 }
 0x20b   :  { %v1172_v63 = vadd.f32 %v872_v34, %v381_v62 }
 0x20d   :  { %419 = vadd.xlane.f32.xlu1 %v1172_v63  ;;  %429 = vadd.xlane.f32.xlu0 %v1170_v61 }
 0x212   :  { %v384_v0 = vpop.f32.mrf.mxu2 }
 0x213   :  { %v1176_v1 = vadd.f32 %v872_v34, %v384_v0 }
 0x215   :  { %421 = vadd.xlane.f32.xlu2 %v1176_v1 }
 0x21d   :  { %427 = vadd.xlane.f32.xlu2 %v1179_v2 }
 0x230   :  { %v400_v5 = vpop.xlane.xlu0 %399 }
 0x231   :  { %v431_v6 = vmul.f32 0.0625, %v400_v5 }
 0x233   :  { %v450_v7 = vsub.f32 %v352_v36, %v431_v6 }
 0x235   :  { %v1187_v8 = vsel %vm449_vm0, %v450_v7, 0.0 }
 0x236   :  { %v482_v9 = vmul.f32 %v1187_v8, %v1187_v8 }
 0x238   :  { %498 = vadd.xlane.f32.xlu1 %v482_v9  ;;  %v402_v10 = vpop.xlane.xlu0 %401 }
 0x239   :  { %v432_v11 = vmul.f32 0.0625, %v402_v10 }
 0x23b   :  { %v451_v12 = vsub.f32 %v355_v38, %v432_v11 }
 0x23d   :  { %v1193_v13 = vsel %vm449_vm0, %v451_v12, 0.0 }
 0x23e   :  { %v483_v14 = vmul.f32 %v1193_v13, %v1193_v13 }
 0x240   :  { %v404_v15 = vpop.xlane.xlu1 %403  ;;  %500 = vadd.xlane.f32.xlu2 %v483_v14  ;;  %v424_v16 = vpop.xlane.xlu0 %423 }
 0x241   :  { %v433_v17 = vmul.f32 0.0625, %v404_v15  ;;  %v443_v18 = vmul.f32 0.0625, %v424_v16 }
 0x243   :  { %v452_v19 = vsub.f32 %v358_v42, %v433_v17  ;;  %v462_v20 = vsub.f32 %v1143_v40, %v443_v18 }
 0x245   :  { %v1200_v21 = vsel %vm449_vm0, %v452_v19, 0.0  ;;  %v1204_v22 = vsel %vm449_vm0, %v462_v20, 0.0 }
 0x246   :  { %v484_v23 = vmul.f32 %v1200_v21, %v1200_v21  ;;  %v494_v24 = vmul.f32 %v1204_v22, %v1204_v22 }
 0x248   :  { %v426_v25 = vpop.xlane.xlu1 %425  ;;  %502 = vadd.xlane.f32.xlu0 %v484_v23  ;;  %522 = vadd.xlane.f32.xlu1 %v494_v24 }
 0x249   :  { %v444_v9 = vmul.f32 0.0625, %v426_v25 }
 0x24b   :  { %v463_v16 = vsub.f32 %v1146_v44, %v444_v9 }
 0x24d   :  { %v1277_v18 = vsel %vm449_vm0, %v463_v16, 0.0 }
 0x24e   :  { %v495_v44 = vmul.f32 %v1277_v18, %v1277_v18 }
 0x250   :  { %v408_v26 = vpop.xlane.xlu2 %407  ;;  %v406_v27 = vpop.xlane.xlu1 %405 }
 0x251   :  { %v435_v28 = vmul.f32 0.0625, %v408_v26  ;;  %v434_v29 = vmul.f32 0.0625, %v406_v27 }
 0x253   :  { %v454_v30 = vsub.f32 %v1151_v49, %v435_v28  ;;  %v453_v31 = vsub.f32 %v1149_v47, %v434_v29 }
 0x255   :  { %v1214_v32 = vsel %vm449_vm0, %v454_v30, 0.0  ;;  %v1218_v33 = vsel %vm449_vm0, %v453_v31, 0.0 }
 0x256   :  { %v486_v34 = vmul.f32 %v1214_v32, %v1214_v32  ;;  %v485_v35 = vmul.f32 %v1218_v33, %v1218_v33 }
 0x258   :  { %v410_v36 = vpop.xlane.xlu2 %409  ;;  %506 = vadd.xlane.f32.xlu2 %v486_v34  ;;  %504 = vadd.xlane.f32.xlu1 %v485_v35 }
 0x259   :  { %v436_v37 = vmul.f32 0.0625, %v410_v36 }
 0x25b   :  { %v455_v38 = vsub.f32 %v1155_v51, %v436_v37 }
 0x25d   :  { %v1227_v39 = vsel %vm449_vm0, %v455_v38, 0.0 }
 0x25e   :  { %v487_v40 = vmul.f32 %v1227_v39, %v1227_v39 }
 0x260   :  { %508 = vadd.xlane.f32.xlu0 %v487_v40  ;;  %v412_v41 = vpop.xlane.xlu0 %411 }
 0x261   :  { %v437_v42 = vmul.f32 0.0625, %v412_v41 }
 0x263   :  { %v456_v43 = vsub.f32 %v1158_v53, %v437_v42 }
 0x265   :  { %v1234_v45 = vsel %vm449_vm0, %v456_v43, 0.0 }
 0x266   :  { %v488_v46 = vmul.f32 %v1234_v45, %v1234_v45 }
 0x268   :  { %v414_v47 = vpop.xlane.xlu1 %413  ;;  %510 = vadd.xlane.f32.xlu1 %v488_v46 }
 0x269   :  { %v438_v49 = vmul.f32 0.0625, %v414_v47 }
 0x26b   :  { %v457_v50 = vsub.f32 %v1161_v54, %v438_v49 }
 0x26d   :  { %v1241_v51 = vsel %vm449_vm0, %v457_v50, 0.0 }
 0x26e   :  { %v489_v52 = vmul.f32 %v1241_v51, %v1241_v51 }
 0x270   :  { %v416_v53 = vpop.xlane.xlu2 %415  ;;  %512 = vadd.xlane.f32.xlu2 %v489_v52  ;;  %v1297_v52 = vld [vmem:[%s1370_s7] ss:$0 sm:$0xff]  ;;  %s1041_s7 = smov [#allocation10]  }
 0x271   :  { %v439_v48 = vmul.f32 0.0625, %v416_v53 }
 0x273   :  { %v458_v55 = vsub.f32 %v1164_v56, %v439_v48 }
 0x275   :  { %v1248_v57 = vsel %vm449_vm0, %v458_v55, 0.0  ;;  %v1302_v55 = vld [vmem:[%s1371_s8] ss:$0 sm:$0xff]  ;;  %s798_s8 = sshll.u32 %s1041_s7, 4  ;;  %s799_s8 = int_to_ptr.vmem [resolvable:$true] %s798_s8 }
 0x276   :  { %v490_v58 = vmul.f32 %v1248_v57, %v1248_v57 }
 0x278   :  { %514 = vadd.xlane.f32.xlu0 %v490_v58  ;;  %v418_v54 = vpop.xlane.xlu0 %417 }
 0x279   :  { %v440_v60 = vmul.f32 0.0625, %v418_v54 }
 0x27b   :  { %v459_v62 = vsub.f32 %v1167_v59, %v440_v60 }
 0x27d   :  { %v1255_v0 = vsel %vm449_vm0, %v459_v62, 0.0 }
 0x27e   :  { %v491_v3 = vmul.f32 %v1255_v0, %v1255_v0 }
 0x280   :  { %v420_v56 = vpop.xlane.xlu1 %419  ;;  %516 = vadd.xlane.f32.xlu1 %v491_v3  ;;  %v430_v5 = vpop.xlane.xlu0 %429 }
 0x281   :  { %v441_v6 = vmul.f32 0.0625, %v420_v56  ;;  %v446_v7 = vmul.f32 0.0625, %v430_v5 }
 0x283   :  { %v460_v10 = vsub.f32 %v1172_v63, %v441_v6  ;;  %v465_v11 = vsub.f32 %v1170_v61, %v446_v7 }
 0x285   :  { %v1263_v59 = vsel %vm449_vm0, %v460_v10, 0.0  ;;  %v1267_v12 = vsel %vm449_vm0, %v465_v11, 0.0 }
 0x286   :  { %v492_v14 = vmul.f32 %v1263_v59, %v1263_v59  ;;  %v497_v15 = vmul.f32 %v1267_v12, %v1267_v12 }
 0x288   :  { %v422_v17 = vpop.xlane.xlu2 %421  ;;  %518 = vadd.xlane.f32.xlu2 %v492_v14  ;;  %528 = vadd.xlane.f32.xlu1 %v497_v15 }
 0x289   :  { %v442_v61 = vmul.f32 0.0625, %v422_v17 }
 0x28b   :  { %v461_v63 = vsub.f32 %v1176_v1, %v442_v61 }
 0x28d   :  { %v1281_v19 = vsel %vm449_vm0, %v461_v63, 0.0 }
 0x28e   :  { %v493_v20 = vmul.f32 %v1281_v19, %v1281_v19 }
 0x290   :  { %v428_v23 = vpop.xlane.xlu2 %427  ;;  %520 = vadd.xlane.f32.xlu0 %v493_v20  ;;  %524 = vadd.xlane.f32.xlu2 %v495_v44 }
 0x291   :  { %v445_v24 = vmul.f32 0.0625, %v428_v23 }
 0x293   :  { %v464_v1 = vsub.f32 %v1179_v2, %v445_v24 }
 0x295   :  { %v1290_v25 = vsel %vm449_vm0, %v464_v1, 0.0 }
 0x296   :  { %v496_v26 = vmul.f32 %v1290_v25, %v1290_v25 }
 0x298   :  { %526 = vadd.xlane.f32.xlu0 %v496_v26 }
 0x2ab   :  { %v499_v27 = vpop.xlane.xlu1 %498 }
 0x2ac   :  { %v530_v28 = vmul.f32 0.0625, %v499_v27 }
 0x2ae   :  { %v546_v29 = vadd.f32 1e-05, %v530_v28 }
 0x2b0   :  { %875 = vrsqrt.f32 %v546_v29  ;;  %vm568_vm2 = vweird.f32 %v546_v29 }
 0x2b3   :  { %v501_v30 = vpop.xlane.xlu2 %500 }
 0x2b4   :  { %v531_v31 = vmul.f32 0.0625, %v501_v30 }
 0x2b6   :  { %v876_v34 = vpop.eup %875  ;;  %v547_v35 = vadd.f32 1e-05, %v531_v31 }
 0x2b7   :  { %v563_v36 = vmul.f32 %v876_v34, %v546_v29  ;;  %vm569_vm1 = vweird.f32 %v876_v34 }
 0x2b8   :  { %877 = vrsqrt.f32 %v547_v35  ;;  %vm570_vm3 = vmor %vm568_vm2, %vm569_vm1  ;;  %vm578_vm5 = vweird.f32 %v547_v35 }
 0x2b9   :  { %v564_v37 = vmul.f32 %v876_v34, %v563_v36 }
 0x2bb   :  { %v565_v2 = vmul.f32 0.5, %v564_v37  ;;  %v523_v38 = vpop.xlane.xlu1 %522  ;;  %v503_v4 = vpop.xlane.xlu0 %502 }
 0x2bc   :  { %v542_v40 = vmul.f32 0.0625, %v523_v38  ;;  %v532_v41 = vmul.f32 0.0625, %v503_v4 }
 0x2bd   :  { %v566_v42 = vsub.f32 1.5, %v565_v2 }
 0x2be   :  { %v878_v43 = vpop.eup %877  ;;  %v558_v46 = vadd.f32 1e-05, %v542_v40  ;;  %v548_v47 = vadd.f32 1e-05, %v532_v41 }
 0x2bf   :  { %v567_v49 = vmul.f32 %v876_v34, %v566_v42  ;;  %v573_v50 = vmul.f32 %v878_v43, %v547_v35  ;;  %vm579_vm4 = vweird.f32 %v878_v43 }
 0x2c0   :  { %879 = vrsqrt.f32 %v558_v46  ;;  %vm580_vm6 = vmor %vm578_vm5, %vm579_vm4  ;;  %vm688_vm9 = vweird.f32 %v558_v46  ;;  %vm588_vm11 = vweird.f32 %v548_v47 }
 0x2c1   :  { %v571_v53 = vsel %vm570_vm3, %v876_v34, %v567_v49  ;;  %v574_v48 = vmul.f32 %v878_v43, %v573_v50  ;;  %881 = vrsqrt.f32 %v548_v47 }
 0x2c2   :  { %v722_v58 = vmul.f32 %v571_v53, %v1187_v8 }
 0x2c3   :  { %v575_v54 = vmul.f32 0.5, %v574_v48 }
 0x2c4   :  { %v742_v60 = vmul.f32 %v1297_v52, %v722_v58 }
 0x2c5   :  { %v576_v62 = vsub.f32 1.5, %v575_v54 }
 0x2c6   :  { %v880_v3 = vpop.eup %879  ;;  %v762_v56 = vadd.f32 %v1302_v55, %v742_v60 }
 0x2c7   :  { %v882_v5 = vpop.eup %881  ;;  %v577_v6 = vmul.f32 %v878_v43, %v576_v62  ;;  %v683_v7 = vmul.f32 %v880_v3, %v558_v46  ;;  %vm689_vm7 = vweird.f32 %v880_v3 }
 0x2c8   :  { %778 = vst [vmem:[#allocation10] sm:$0xff] %v762_v56  ;;  %v583_v9 = vmul.f32 %v882_v5, %v548_v47  ;;  %vm589_vm8 = vweird.f32 %v882_v5  ;;  %vm690_vm10 = vmor %vm688_vm9, %vm689_vm7 }
 0x2c9   :  { %v581_v10 = vsel %vm580_vm6, %v878_v43, %v577_v6  ;;  %v684_v11 = vmul.f32 %v880_v3, %v683_v7  ;;  %vm590_vm12 = vmor %vm588_vm11, %vm589_vm8 }
 0x2ca   :  { %v723_v14 = vmul.f32 %v581_v10, %v1193_v13  ;;  %v584_v8 = vmul.f32 %v882_v5, %v583_v9 }
 0x2cb   :  { %v685_v15 = vmul.f32 0.5, %v684_v11  ;;  %v507_v16 = vpop.xlane.xlu2 %506  ;;  %v505_v17 = vpop.xlane.xlu1 %504 }
 0x2cc   :  { %v743_v61 = vmul.f32 %v1297_v52, %v723_v14  ;;  %v585_v63 = vmul.f32 0.5, %v584_v8  ;;  %v534_v20 = vmul.f32 0.0625, %v507_v16  ;;  %v533_v44 = vmul.f32 0.0625, %v505_v17 }
 0x2cd   :  { %v686_v23 = vsub.f32 1.5, %v685_v15 }
 0x2ce   :  { %v763_v24 = vadd.f32 %v1302_v55, %v743_v61  ;;  %v586_v1 = vsub.f32 1.5, %v585_v63  ;;  %v550_v26 = vadd.f32 1e-05, %v534_v20  ;;  %v549_v27 = vadd.f32 1e-05, %v533_v44 }
 0x2cf   :  { %v687_v28 = vmul.f32 %v880_v3, %v686_v23 }
 0x2d0   :  { %779 = vst [vmem:[#allocation10 + $0x8] sm:$0xff] %v763_v24  ;;  %v587_v13 = vmul.f32 %v882_v5, %v586_v1  ;;  %883 = vrsqrt.f32 %v550_v26  ;;  %vm608_vm15 = vweird.f32 %v550_v26  ;;  %vm598_vm1 = vweird.f32 %v549_v27 }
 0x2d1   :  { %v691_v29 = vsel %vm690_vm10, %v880_v3, %v687_v28  ;;  %885 = vrsqrt.f32 %v549_v27 }
 0x2d2   :  { %v734_v30 = vmul.f32 %v691_v29, %v1204_v22  ;;  %v591_v31 = vsel %vm590_vm12, %v882_v5, %v587_v13 }
 0x2d3   :  { %v724_v34 = vmul.f32 %v591_v31, %v1200_v21  ;;  %v509_v35 = vpop.xlane.xlu0 %508 }
 0x2d4   :  { %v754_v36 = vmul.f32 %v1297_v52, %v734_v30  ;;  %v535_v37 = vmul.f32 0.0625, %v509_v35 }
 0x2d5   :  { %v744_v2 = vmul.f32 %v1297_v52, %v724_v34 }
 0x2d6   :  { %v884_v38 = vpop.eup %883  ;;  %v774_v4 = vadd.f32 %v1302_v55, %v754_v36  ;;  %v551_v40 = vadd.f32 1e-05, %v535_v37 }
 0x2d7   :  { %v886_v41 = vpop.eup %885  ;;  %v764_v42 = vadd.f32 %v1302_v55, %v744_v2  ;;  %v603_v43 = vmul.f32 %v884_v38, %v550_v26  ;;  %vm609_vm13 = vweird.f32 %v884_v38 }
 0x2d8   :  { %790 = vst [vmem:[#allocation10 + $0x60] sm:$0xff] %v774_v4  ;;  %v593_v46 = vmul.f32 %v886_v41, %v549_v27  ;;  %887 = vrsqrt.f32 %v551_v40  ;;  %vm599_vm14 = vweird.f32 %v886_v41  ;;  %vm610_vm0 = vmor %vm608_vm15, %vm609_vm13  ;;  %vm618_vm4 = vweird.f32 %v551_v40 }
 0x2d9   :  { %780 = vst [vmem:[#allocation10 + $0x10] sm:$0xff] %v764_v42  ;;  %v604_v22 = vmul.f32 %v884_v38, %v603_v43  ;;  %vm600_vm2 = vmor %vm598_vm1, %vm599_vm14 }
 0x2da   :  { %v594_v21 = vmul.f32 %v886_v41, %v593_v46 }
 0x2db   :  { %v605_v47 = vmul.f32 0.5, %v604_v22  ;;  %v511_v49 = vpop.xlane.xlu1 %510 }
 0x2dc   :  { %v595_v50 = vmul.f32 0.5, %v594_v21  ;;  %v536_v53 = vmul.f32 0.0625, %v511_v49 }
 0x2dd   :  { %v606_v48 = vsub.f32 1.5, %v605_v47 }
 0x2de   :  { %v888_v58 = vpop.eup %887  ;;  %v596_v54 = vsub.f32 1.5, %v595_v50  ;;  %v552_v60 = vadd.f32 1e-05, %v536_v53 }
 0x2df   :  { %v607_v62 = vmul.f32 %v884_v38, %v606_v48  ;;  %v613_v3 = vmul.f32 %v888_v58, %v551_v40  ;;  %vm619_vm3 = vweird.f32 %v888_v58 }
 0x2e0   :  { %v597_v56 = vmul.f32 %v886_v41, %v596_v54  ;;  %889 = vrsqrt.f32 %v552_v60  ;;  %vm620_vm5 = vmor %vm618_vm4, %vm619_vm3  ;;  %vm628_vm7 = vweird.f32 %v552_v60 }
 0x2e1   :  { %v611_v5 = vsel %vm610_vm0, %v884_v38, %v607_v62  ;;  %v614_v6 = vmul.f32 %v888_v58, %v613_v3 }
 0x2e2   :  { %v726_v7 = vmul.f32 %v611_v5, %v1214_v32  ;;  %v601_v9 = vsel %vm600_vm2, %v886_v41, %v597_v56 }
 0x2e3   :  { %v725_v10 = vmul.f32 %v601_v9, %v1218_v33  ;;  %v615_v11 = vmul.f32 0.5, %v614_v6  ;;  %v513_v14 = vpop.xlane.xlu2 %512 }
 0x2e4   :  { %v746_v8 = vmul.f32 %v1297_v52, %v726_v7  ;;  %v537_v15 = vmul.f32 0.0625, %v513_v14 }
 0x2e5   :  { %v745_v16 = vmul.f32 %v1297_v52, %v725_v10  ;;  %v616_v17 = vsub.f32 1.5, %v615_v11 }
 0x2e6   :  { %v890_v61 = vpop.eup %889  ;;  %v766_v63 = vadd.f32 %v1302_v55, %v746_v8  ;;  %v553_v20 = vadd.f32 1e-05, %v537_v15 }
 0x2e7   :  { %v765_v44 = vadd.f32 %v1302_v55, %v745_v16  ;;  %v617_v23 = vmul.f32 %v888_v58, %v616_v17  ;;  %v623_v32 = vmul.f32 %v890_v61, %v552_v60  ;;  %vm629_vm6 = vweird.f32 %v890_v61 }
 0x2e8   :  { %782 = vst [vmem:[#allocation10 + $0x20] sm:$0xff] %v766_v63  ;;  %891 = vrsqrt.f32 %v553_v20  ;;  %vm630_vm8 = vmor %vm628_vm7, %vm629_vm6  ;;  %vm638_vm10 = vweird.f32 %v553_v20 }
 0x2e9   :  { %781 = vst [vmem:[#allocation10 + $0x18] sm:$0xff] %v765_v44  ;;  %v621_v33 = vsel %vm620_vm5, %v888_v58, %v617_v23  ;;  %v624_v24 = vmul.f32 %v890_v61, %v623_v32 }
 0x2ea   :  { %v727_v1 = vmul.f32 %v621_v33, %v1227_v39 }
 0x2eb   :  { %v625_v26 = vmul.f32 0.5, %v624_v24  ;;  %v515_v27 = vpop.xlane.xlu0 %514 }
 0x2ec   :  { %v747_v28 = vmul.f32 %v1297_v52, %v727_v1  ;;  %v538_v13 = vmul.f32 0.0625, %v515_v27 }
 0x2ed   :  { %v626_v29 = vsub.f32 1.5, %v625_v26 }
 0x2ee   :  { %v892_v30 = vpop.eup %891  ;;  %v767_v31 = vadd.f32 %v1302_v55, %v747_v28  ;;  %v554_v34 = vadd.f32 1e-05, %v538_v13 }
 0x2ef   :  { %v627_v35 = vmul.f32 %v890_v61, %v626_v29  ;;  %v633_v36 = vmul.f32 %v892_v30, %v553_v20  ;;  %vm639_vm9 = vweird.f32 %v892_v30 }
 0x2f0   :  { %783 = vst [vmem:[#allocation10 + $0x28] sm:$0xff] %v767_v31  ;;  %893 = vrsqrt.f32 %v554_v34  ;;  %vm640_vm11 = vmor %vm638_vm10, %vm639_vm9  ;;  %vm648_vm13 = vweird.f32 %v554_v34 }
 0x2f1   :  { %v631_v37 = vsel %vm630_vm8, %v890_v61, %v627_v35  ;;  %v634_v2 = vmul.f32 %v892_v30, %v633_v36 }
 0x2f2   :  { %v728_v39 = vmul.f32 %v631_v37, %v1234_v45 }
 0x2f3   :  { %v635_v38 = vmul.f32 0.5, %v634_v2  ;;  %v517_v4 = vpop.xlane.xlu1 %516 }
 0x2f4   :  { %v748_v40 = vmul.f32 %v1297_v52, %v728_v39  ;;  %v539_v41 = vmul.f32 0.0625, %v517_v4 }
 0x2f5   :  { %v636_v42 = vsub.f32 1.5, %v635_v38 }
 0x2f6   :  { %v894_v43 = vpop.eup %893  ;;  %v768_v46 = vadd.f32 %v1302_v55, %v748_v40  ;;  %v555_v22 = vadd.f32 1e-05, %v539_v41 }
 0x2f7   :  { %v637_v21 = vmul.f32 %v892_v30, %v636_v42  ;;  %v643_v47 = vmul.f32 %v894_v43, %v554_v34  ;;  %vm649_vm12 = vweird.f32 %v894_v43 }
 0x2f8   :  { %784 = vst [vmem:[#allocation10 + $0x30] sm:$0xff] %v768_v46  ;;  %895 = vrsqrt.f32 %v555_v22  ;;  %vm650_vm14 = vmor %vm648_vm13, %vm649_vm12  ;;  %vm658_vm0 = vweird.f32 %v555_v22 }
 0x2f9   :  { %v641_v49 = vsel %vm640_vm11, %v892_v30, %v637_v21  ;;  %v644_v50 = vmul.f32 %v894_v43, %v643_v47 }
 0x2fa   :  { %v729_v45 = vmul.f32 %v641_v49, %v1241_v51 }
 0x2fb   :  { %v645_v53 = vmul.f32 0.5, %v644_v50  ;;  %v519_v48 = vpop.xlane.xlu2 %518  ;;  %v529_v58 = vpop.xlane.xlu1 %528 }
 0x2fc   :  { %v749_v54 = vmul.f32 %v1297_v52, %v729_v45  ;;  %v540_v60 = vmul.f32 0.0625, %v519_v48  ;;  %v545_v62 = vmul.f32 0.0625, %v529_v58 }
 0x2fd   :  { %v646_v3 = vsub.f32 1.5, %v645_v53 }
 0x2fe   :  { %v896_v56 = vpop.eup %895  ;;  %v769_v5 = vadd.f32 %v1302_v55, %v749_v54  ;;  %v556_v6 = vadd.f32 1e-05, %v540_v60  ;;  %v561_v7 = vadd.f32 1e-05, %v545_v62 }
 0x2ff   :  { %v647_v9 = vmul.f32 %v894_v43, %v646_v3  ;;  %v653_v10 = vmul.f32 %v896_v56, %v555_v22  ;;  %vm659_vm15 = vweird.f32 %v896_v56 }
 0x300   :  { %785 = vst [vmem:[#allocation10 + $0x38] sm:$0xff] %v769_v5  ;;  %897 = vrsqrt.f32 %v556_v6  ;;  %vm660_vm1 = vmor %vm658_vm0, %vm659_vm15  ;;  %vm668_vm4 = vweird.f32 %v556_v6  ;;  %vm718_vm6 = vweird.f32 %v561_v7 }
 0x301   :  { %v651_v51 = vsel %vm650_vm14, %v894_v43, %v647_v9  ;;  %v654_v11 = vmul.f32 %v896_v56, %v653_v10  ;;  %899 = vrsqrt.f32 %v561_v7 }
 0x302   :  { %v730_v14 = vmul.f32 %v651_v51, %v1248_v57 }
 0x303   :  { %v655_v8 = vmul.f32 0.5, %v654_v11  ;;  %v525_v15 = vpop.xlane.xlu2 %524  ;;  %v521_v16 = vpop.xlane.xlu0 %520 }
 0x304   :  { %v750_v17 = vmul.f32 %v1297_v52, %v730_v14  ;;  %v543_v61 = vmul.f32 0.0625, %v525_v15  ;;  %v541_v63 = vmul.f32 0.0625, %v521_v16 }
 0x305   :  { %v656_v20 = vsub.f32 1.5, %v655_v8 }
 0x306   :  { %v898_v44 = vpop.eup %897  ;;  %v770_v23 = vadd.f32 %v1302_v55, %v750_v17  ;;  %v559_v32 = vadd.f32 1e-05, %v543_v61  ;;  %v1334_v33 = vadd.f32 1e-05, %v541_v63 }
 0x307   :  { %v900_v24 = vpop.eup %899  ;;  %v657_v1 = vmul.f32 %v896_v56, %v656_v20  ;;  %v663_v26 = vmul.f32 %v898_v44, %v556_v6  ;;  %vm669_vm2 = vweird.f32 %v898_v44 }
 0x308   :  { %786 = vst [vmem:[#allocation10 + $0x40] sm:$0xff] %v770_v23  ;;  %v713_v57 = vmul.f32 %v900_v24, %v561_v7  ;;  %901 = vrsqrt.f32 %v559_v32  ;;  %vm719_vm3 = vweird.f32 %v900_v24  ;;  %vm670_vm5 = vmor %vm668_vm4, %vm669_vm2  ;;  %vm698_vm10 = vweird.f32 %v559_v32 }
 0x309   :  { %v661_v27 = vsel %vm660_vm1, %v896_v56, %v657_v1  ;;  %v664_v28 = vmul.f32 %v898_v44, %v663_v26  ;;  %903 = vrsqrt.f32 %v1334_v33  ;;  %vm720_vm7 = vmor %vm718_vm6, %vm719_vm3  ;;  %vm678_vm12 = vweird.f32 %v1334_v33 }
 0x30a   :  { %v731_v13 = vmul.f32 %v661_v27, %v1255_v0  ;;  %v714_v29 = vmul.f32 %v900_v24, %v713_v57 }
 0x30b   :  { %v665_v30 = vmul.f32 0.5, %v664_v28  ;;  %v527_v31 = vpop.xlane.xlu0 %526 }
 0x30c   :  { %v751_v34 = vmul.f32 %v1297_v52, %v731_v13  ;;  %v715_v35 = vmul.f32 0.5, %v714_v29  ;;  %v544_v36 = vmul.f32 0.0625, %v527_v31 }
 0x30d   :  { %v666_v37 = vsub.f32 1.5, %v665_v30 }
 0x30e   :  { %v902_v2 = vpop.eup %901  ;;  %v771_v39 = vadd.f32 %v1302_v55, %v751_v34  ;;  %v716_v38 = vsub.f32 1.5, %v715_v35  ;;  %v560_v4 = vadd.f32 1e-05, %v544_v36 }
 0x30f   :  { %v904_v40 = vpop.eup %903  ;;  %v667_v41 = vmul.f32 %v898_v44, %v666_v37  ;;  %v693_v42 = vmul.f32 %v902_v2, %v559_v32  ;;  %vm699_vm8 = vweird.f32 %v902_v2 }
 0x310   :  { %787 = vst [vmem:[#allocation10 + $0x48] sm:$0xff] %v771_v39  ;;  %v717_v0 = vmul.f32 %v900_v24, %v716_v38  ;;  %v673_v43 = vmul.f32 %v904_v40, %v1334_v33  ;;  %905 = vrsqrt.f32 %v560_v4  ;;  %vm679_vm9 = vweird.f32 %v904_v40  ;;  %vm700_vm11 = vmor %vm698_vm10, %vm699_vm8 }
 0x311   :  { %v671_v46 = vsel %vm670_vm5, %v898_v44, %v667_v41  ;;  %v694_v22 = vmul.f32 %v902_v2, %v693_v42  ;;  %vm680_vm13 = vmor %vm678_vm12, %vm679_vm9  ;;  %vm708_vm15 = vweird.f32 %v560_v4 }
 0x312   :  { %v732_v21 = vmul.f32 %v671_v46, %v1263_v59  ;;  %v721_v47 = vsel %vm720_vm7, %v900_v24, %v717_v0  ;;  %v674_v49 = vmul.f32 %v904_v40, %v673_v43 }
 0x313   :  { %v737_v50 = vmul.f32 %v721_v47, %v1267_v12  ;;  %v695_v45 = vmul.f32 0.5, %v694_v22 }
 0x314   :  { %v752_v53 = vmul.f32 %v1297_v52, %v732_v21  ;;  %v675_v48 = vmul.f32 0.5, %v674_v49 }
 0x315   :  { %v757_v58 = vmul.f32 %v1297_v52, %v737_v50  ;;  %v696_v54 = vsub.f32 1.5, %v695_v45 }
 0x316   :  { %v906_v60 = vpop.eup %905  ;;  %v772_v62 = vadd.f32 %v1302_v55, %v752_v53  ;;  %v676_v3 = vsub.f32 1.5, %v675_v48 }
 0x317   :  { %v777_v56 = vadd.f32 %v1302_v55, %v757_v58  ;;  %v697_v59 = vmul.f32 %v902_v2, %v696_v54  ;;  %v703_v5 = vmul.f32 %v906_v60, %v560_v4  ;;  %vm709_vm14 = vweird.f32 %v906_v60 }
 0x318   :  { %788 = vst [vmem:[#allocation10 + $0x50] sm:$0xff] %v772_v62  ;;  %v677_v12 = vmul.f32 %v904_v40, %v676_v3  ;;  %vm710_vm0 = vmor %vm708_vm15, %vm709_vm14 }
 0x319   :  { %793 = vst [vmem:[#allocation10 + $0x78] sm:$0xff] %v777_v56  ;;  %v701_v6 = vsel %vm700_vm11, %v902_v2, %v697_v59  ;;  %v704_v7 = vmul.f32 %v906_v60, %v703_v5 }
 0x31a   :  { %v735_v9 = vmul.f32 %v701_v6, %v1277_v18  ;;  %v681_v10 = vsel %vm680_vm13, %v904_v40, %v677_v12 }
 0x31b   :  { %v733_v51 = vmul.f32 %v681_v10, %v1281_v19  ;;  %v705_v11 = vmul.f32 0.5, %v704_v7 }
 0x31c   :  { %v755_v14 = vmul.f32 %v1297_v52, %v735_v9 }
 0x31d   :  { %v753_v8 = vmul.f32 %v1297_v52, %v733_v51  ;;  %v706_v15 = vsub.f32 1.5, %v705_v11 }
 0x31e   :  { %v775_v16 = vadd.f32 %v1302_v55, %v755_v14 }
 0x31f   :  { %v773_v17 = vadd.f32 %v1302_v55, %v753_v8  ;;  %v707_v61 = vmul.f32 %v906_v60, %v706_v15 }
 0x320   :  { %791 = vst [vmem:[#allocation10 + $0x68] sm:$0xff] %v775_v16 }
 0x321   :  { %789 = vst [vmem:[#allocation10 + $0x58] sm:$0xff] %v773_v17  ;;  %v711_v18 = vsel %vm710_vm0, %v906_v60, %v707_v61 }
 0x322   :  { %v736_v63 = vmul.f32 %v711_v18, %v1290_v25 }
 0x324   :  { %v756_v19 = vmul.f32 %v1297_v52, %v736_v63 }
 0x326   :  { %v776_v20 = vadd.f32 %v1302_v55, %v756_v19 }
 0x328   :  { %792 = vst [vmem:[#allocation10 + $0x70] sm:$0xff] %v776_v20 }
 0x329   :  { %806 = dma.vmem_to_hbm [thread:$0]  %s799_s8, 2048, %s801_s15, [#allocation4], %s1036_s17, %s1036_s17, %s1037_s18  }
 0x32a   :  { %1033 = dma.done.wait [#allocation4], 2048  }
 0x32b   :  { %1034 = vsyncadd [#allocation4], 4294965248 }
 0x32c   :  { %811 = vsyncpa [#allocation3], 1 }
 0x32d   :  { %812 = vsyncpa [#allocation6], 1 }
 0x32e   :  { %813 = vsyncpa [#allocation9], 1 }
 0x32f   :  { %814 = vsyncpa [#allocation4], 1 }

</bundles_post_ra>
